<compile_context>
chip_gen: v7x
topology: tpu7x:2x2x1
jax: 0.10.0
libtpu: 0.0.40
codegen_flags: <defaults>
</compile_context>

<pallas_src>
import functools

import jax
import jax.numpy as jnp
from jax import lax
from jax.experimental import pallas as pl
from jax.experimental.pallas import tpu as pltpu

EPS = 1e-12      # matches torch.nn.functional.normalize default eps
_NEG = -1e30     # finite "minus infinity" for masked (padded) class columns


def _round_up(x, m):
    return ((x + m - 1) // m) * m


def _default_exp_dtype():
    # bf16 exp roughly doubles EUP throughput on v6e/v7x; v5e and older have no
    # bf16 EUP/VPU, so keep the softmax exp in f32 there.
    try:
        kind = jax.devices()[0].device_kind.lower()
    except Exception:
        return jnp.float32
    if any(tag in kind for tag in ("v2", "v3", "v4", "v5")):
        return jnp.float32
    return jnp.bfloat16


def _vmem_capacity_bytes():
    try:
        return int(pltpu.get_tpu_info().vmem_capacity_bytes)
    except Exception:
        return 64 * (1 << 20)   # conservative fallback (v7x: 64 MiB per TC)


def _per_batch_vmem_bytes(Pq, Pc, D, chunk, store_itemsize):
    """Rough per-batch-element VMEM footprint (layout-padded) for one step."""
    d_l = _round_up(D, 128)
    q_l = _round_up(Pq, 128)
    inp = 2 * (_round_up(Pq, 8) + _round_up(Pc, 8)) * d_l * store_itemsize  # dbl-buffered inputs
    feat = 4 * (_round_up(Pq, 8) + _round_up(chunk, 8)) * d_l * 4           # f32/normalized temporaries
    logit = 5 * _round_up(chunk, 8) * q_l * 4                               # logits/exp/iota/select temps
    return inp + feat + logit + 64 * q_l * 4


def _nce_kernel(f0_ref, f1_ref, out_ref, *, inv_temperature, matmul_dtype,
                exp_dtype, chunk, n_chunks, p_real, p_cls_pad):
    """Per-(batch, pair) loss values  lse_j - logit_jj  for one batch block.

    f0_ref : (G, Pq, D)  gathered query rows (storage dtype)
    f1_ref : (G, Pc, D)  gathered class rows, class axis padded to Pc
    out_ref: (G, 1, Pq)  per-pair loss, query axis lane-dense
    """
    G, Pq, _ = f0_ref.shape

    # Normalize queries once in f32; fold 1/T into this (non-chunked) operand.
    f0 = f0_ref[...].astype(jnp.float32)
    inv_n0 = lax.rsqrt(jnp.maximum(jnp.sum(f0 * f0, axis=-1, keepdims=True),
                                   EPS * EPS))
    f0m = (f0 * (inv_n0 * inv_temperature)).astype(matmul_dtype)

    def step(k, carry):
        m_run, s_run, d_run = carry                       # each (G, 1, Pq) f32
        start = k * chunk
        if not isinstance(start, int):
            start = pl.multiple_of(start, chunk)

        # Normalize this chunk of class rows in f32.
        f1 = f1_ref[:, pl.ds(start, chunk), :].astype(jnp.float32)   # (G, C, D)
        inv_n1 = lax.rsqrt(jnp.maximum(jnp.sum(f1 * f1, axis=-1, keepdims=True),
                                       EPS * EPS))
        f1m = (f1 * inv_n1).astype(matmul_dtype)

        # logits[g, c, q] = <f1n[c], f0n[q]> / T : classes on sublanes, queries
        # on lanes. Batched A @ B^T via dot_general (no explicit transpose),
        # low-precision MXU feed with f32 accumulation.
        lg = lax.dot_general(f1m, f0m,
                             dimension_numbers=(((2,), (2,)), ((0,), (0,))),
                             preferred_element_type=jnp.float32)     # (G, C, Pq)

        cls_idx = lax.broadcasted_iota(jnp.int32, (G, chunk, Pq), 1) + k * chunk
        qry_idx = lax.broadcasted_iota(jnp.int32, (G, chunk, Pq), 2)
        if p_cls_pad != p_real:   # zero-padded class rows must not enter the LSE
            lg = jnp.where(cls_idx < p_real, lg, _NEG)

        # Positive logit taken from the same logits matrix (parity with the
        # torch cross_entropy diagonal, including matmul-dtype rounding).
        d_part = jnp.sum(jnp.where(cls_idx == qry_idx, lg, 0.0),
                         axis=1, keepdims=True)                       # (G, 1, Pq)

        # Online (flash-style) softmax update over the class axis.
        m_new = jnp.maximum(m_run, jnp.max(lg, axis=1, keepdims=True))
        p = jnp.exp((lg - m_new).astype(exp_dtype)).astype(jnp.float32)
        s_new = s_run * jnp.exp(m_run - m_new) + jnp.sum(p, axis=1, keepdims=True)
        return m_new, s_new, d_run + d_part

    init = (jnp.full((G, 1, Pq), _NEG, jnp.float32),
            jnp.zeros((G, 1, Pq), jnp.float32),
            jnp.zeros((G, 1, Pq), jnp.float32))
    if n_chunks == 1:
        m_run, s_run, diag = step(0, init)
    else:
        m_run, s_run, diag = lax.fori_loop(0, n_chunks, step, init)

    # Per-pair loss; padded batch rows (if any) are sliced away in the wrapper.
    out_ref[...] = m_run + jnp.log(s_run) - diag


def nce_loss_pallas(feats0, feats1, corrs, num_pos=None, temperature=0.07,
                    matmul_dtype=jnp.bfloat16, exp_dtype=None, class_chunk=None):
    """Forward pass of NCELoss. Returns {'contrast': scalar loss}."""
    B, N, D = feats0.shape
    P = corrs.shape[1]

    # TODO(synk): the np.random.choice subsample branch (host-side RNG, hit when
    # corrs.shape[1] > num_pos) is not reproduced; callers must keep P <= num_pos.
    assert not (num_pos is not None and num_pos > 0 and P > num_pos), \
        "random subsample path not implemented"

    store_dtype = jnp.dtype(matmul_dtype)
    if exp_dtype is None:
        exp_dtype = (jnp.float32 if store_dtype == jnp.dtype(jnp.float32)
                     else _default_exp_dtype())

    # ---- class-axis tiling / padding (all static) ----------------------------
    if class_chunk is None:
        chunk = 512 if P > 1024 else None        # flash-style tiling for large P
    else:
        chunk = int(class_chunk)
    if chunk is None or chunk >= P:
        p_cls_pad = _round_up(P, 256) if P >= 256 else _round_up(P, 8)
        chunk = p_cls_pad
        n_chunks = 1
    else:
        chunk = _round_up(max(chunk, 8), 8)
        p_cls_pad = _round_up(P, chunk)
        n_chunks = p_cls_pad // chunk

    # ---- gather correspondence rows (wrapper-side, stored in the matmul dtype
    # so the round trip is half-width; the feature dim is NOT lane-padded).
    # TODO(synk): move this gather in-kernel (scalar-prefetched corrs + DMA row
    # gather from memory_space=pl.ANY feats refs) to drop the HBM round trip.
    idx0 = corrs[:, :, 0].astype(jnp.int32)
    idx1 = corrs[:, :, 1].astype(jnp.int32)
    f0_sel = jnp.take_along_axis(feats0.astype(store_dtype), idx0[:, :, None], axis=1)
    f1_sel = jnp.take_along_axis(feats1.astype(store_dtype), idx1[:, :, None], axis=1)
    if p_cls_pad != P:
        f1_sel = jnp.pad(f1_sel, ((0, 0), (0, p_cls_pad - P), (0, 0)))

    # ---- batch blocking: largest G fitting the generation-aware VMEM budget,
    # clamped so the grid keeps >=2 (>=4 when possible) parallel steps.
    cap = _vmem_capacity_bytes()
    per_batch = _per_batch_vmem_bytes(P, p_cls_pad, D, chunk, store_dtype.itemsize)
    budget = max(4 << 20, int(cap * 0.22))
    G = max(1, min(B, budget // max(per_batch, 1)))
    target_steps = 1 if B < 2 else (2 if B < 4 else 4)
    G = max(1, min(G, -(-B // target_steps)))
    nb = -(-B // G)
    B_pad = nb * G
    if B_pad != B:
        pad = ((0, B_pad - B), (0, 0), (0, 0))
        f0_sel = jnp.pad(f0_sel, pad)
        f1_sel = jnp.pad(f1_sel, pad)

    est = G * per_batch
    vmem_limit = None
    if est > (24 << 20):   # only raise above the default scoped limit, and stay
        vmem_limit = int(min(max(2 * est, 32 << 20), int(cap * 0.55)))  # < phys.

    kernel = functools.partial(
        _nce_kernel,
        inv_temperature=float(1.0 / temperature),
        matmul_dtype=matmul_dtype,
        exp_dtype=exp_dtype,
        chunk=chunk, n_chunks=n_chunks, p_real=P, p_cls_pad=p_cls_pad)

    per_pair = pl.pallas_call(
        kernel,
        out_shape=jax.ShapeDtypeStruct((B_pad, 1, P), jnp.float32),
        grid_spec=pltpu.PrefetchScalarGridSpec(
            num_scalar_prefetch=0,
            grid=(nb,),
            in_specs=[
                pl.BlockSpec((G, P, D), lambda i: (i, 0, 0)),
                pl.BlockSpec((G, p_cls_pad, D), lambda i: (i, 0, 0)),
            ],
            out_specs=pl.BlockSpec((G, 1, P), lambda i: (i, 0, 0)),
        ),
        compiler_params=pltpu.CompilerParams(
            dimension_semantics=("parallel",),   # independent per-block outputs
            vmem_limit_bytes=vmem_limit),
    )(f0_sel, f1_sel)

    loss = jnp.sum(per_pair[:B, 0, :]) / jnp.float32(B * P)
    return {"contrast": loss}


def _reference_loss(feats0, feats1, corrs, temperature=0.07):
    """Pure-JAX reference mirroring the PyTorch semantics (for sanity check)."""
    f0 = feats0 / jnp.maximum(jnp.linalg.norm(feats0, axis=-1, keepdims=True), EPS)
    f1 = feats1 / jnp.maximum(jnp.linalg.norm(feats1, axis=-1, keepdims=True), EPS)
    f0s = jnp.take_along_axis(f0, corrs[:, :, 0][:, :, None], axis=1)
    f1s = jnp.take_along_axis(f1, corrs[:, :, 1][:, :, None], axis=1)
    logits = jnp.einsum("bpd,bqd->bpq", f1s, f0s,
                        precision=lax.Precision.HIGHEST) / temperature  # (B, P, P)
    lse = jax.scipy.special.logsumexp(logits, axis=1)                    # class dim
    diag = jnp.diagonal(logits, axis1=1, axis2=2)
    return jnp.mean(lse - diag)


if __name__ == "__main__":
    key = jax.random.PRNGKey(0)
    k0, k1, kc, k3, k4, k5 = jax.random.split(key, 6)

    # --- Test A: default path (bf16 storage + bf16 MXU feed, f32 LSE math). ---
    B, N, D, P = 2, 16, 32, 8
    feats0 = jax.random.normal(k0, (B, N, D), dtype=jnp.float32)
    feats1 = jax.random.normal(k1, (B, N, D), dtype=jnp.float32)
    corrs = jax.random.randint(kc, (B, P, 2), 0, N, dtype=jnp.int32)

    ref_a = jax.block_until_ready(_reference_loss(feats0, feats1, corrs))
    out_a = nce_loss_pallas(feats0, feats1, corrs, num_pos=8)
    loss_a = jax.block_until_ready(out_a["contrast"])
    assert jnp.allclose(loss_a, ref_a, atol=3e-2, rtol=3e-2), (loss_a, ref_a)

    # --- Test B: f32 MXU path exercising flash-style class-axis chunking,
    # class padding + -inf masking, and odd-batch padding; tight tolerance. ---
    B2, N2, D2, P2 = 3, 24, 32, 30
    f0b = jax.random.normal(k3, (B2, N2, D2), dtype=jnp.float32)
    f1b = jax.random.normal(k4, (B2, N2, D2), dtype=jnp.float32)
    cb = jax.random.randint(k5, (B2, P2, 2), 0, N2, dtype=jnp.int32)

    ref_b = jax.block_until_ready(_reference_loss(f0b, f1b, cb))
    out_b = nce_loss_pallas(f0b, f1b, cb, num_pos=None,
                            matmul_dtype=jnp.float32, class_chunk=16)
    loss_b = jax.block_until_ready(out_b["contrast"])
    assert jnp.allclose(loss_b, ref_b, atol=2e-3, rtol=2e-3), (loss_b, ref_b)

    print("KERNEL_OK")
</pallas_src>

<mosaic_0001>
module attributes {stable_mosaic.version = 11 : i64} {
  func.func @_nce_kernel(%arg0: i32, %arg1: memref<1x8x32xbf16, #tpu.memory_space<vmem>>, %arg2: memref<1x8x32xbf16, #tpu.memory_space<vmem>>, %arg3: memref<1x1x8xf32, #tpu.memory_space<vmem>>) attributes {dimension_semantics = [#tpu.dimension_semantics<parallel>], iteration_bounds = array<i64: 2>, scalar_prefetch = 0 : i64, scratch_operands = 0 : i64, tpu.core_type = #tpu.core_type<tc>, window_params = [{transform_indices = @transform_0, window_bounds = array<i64: 1, 8, 32>}, {transform_indices = @transform_1, window_bounds = array<i64: 1, 8, 32>}, {transform_indices = @transform_2, window_bounds = array<i64: 1, 1, 8>}]} {
    %c0 = arith.constant 0 : index
    %c0_0 = arith.constant 0 : index
    %c0_1 = arith.constant 0 : index
    %0 = vector.load %arg1[%c0, %c0_0, %c0_1] : memref<1x8x32xbf16, #tpu.memory_space<vmem>>, vector<1x8x32xbf16>
    %1 = arith.extf %0 : vector<1x8x32xbf16> to vector<1x8x32xf32>
    %2 = arith.mulf %1, %1 : vector<1x8x32xf32>
    %cst = arith.constant dense<0.000000e+00> : vector<1x8xf32>
    %3 = vector.multi_reduction <add>, %2, %cst [2] : vector<1x8x32xf32> to vector<1x8xf32>
    %4 = vector.shape_cast %3 : vector<1x8xf32> to vector<1x8x1xf32>
    %cst_2 = arith.constant 1.000000e-24 : f32
    %5 = vector.broadcast %cst_2 : f32 to vector<1x8x1xf32>
    %6 = arith.maximumf %4, %5 : vector<1x8x1xf32>
    %7 = math.rsqrt %6 : vector<1x8x1xf32>
    %cst_3 = arith.constant 14.2857141 : f32
    %8 = vector.broadcast %cst_3 : f32 to vector<1x8x1xf32>
    %9 = arith.mulf %7, %8 : vector<1x8x1xf32>
    %10 = vector.broadcast %9 : vector<1x8x1xf32> to vector<1x8x32xf32>
    %11 = arith.mulf %1, %10 : vector<1x8x32xf32>
    %12 = arith.truncf %11 : vector<1x8x32xf32> to vector<1x8x32xbf16>
    %cst_4 = arith.constant -1.000000e+30 : f32
    %13 = vector.broadcast %cst_4 : f32 to vector<1x1x8xf32>
    %cst_5 = arith.constant 0.000000e+00 : f32
    %14 = vector.broadcast %cst_5 : f32 to vector<1x1x8xf32>
    %cst_6 = arith.constant 0.000000e+00 : f32
    %15 = vector.broadcast %cst_6 : f32 to vector<1x1x8xf32>
    %c0_7 = arith.constant 0 : index
    %c0_8 = arith.constant 0 : index
    %c0_9 = arith.constant 0 : index
    %16 = vector.load %arg2[%c0_7, %c0_8, %c0_9] : memref<1x8x32xbf16, #tpu.memory_space<vmem>>, vector<1x8x32xbf16>
    %17 = arith.extf %16 : vector<1x8x32xbf16> to vector<1x8x32xf32>
    %18 = arith.mulf %17, %17 : vector<1x8x32xf32>
    %cst_10 = arith.constant dense<0.000000e+00> : vector<1x8xf32>
    %19 = vector.multi_reduction <add>, %18, %cst_10 [2] : vector<1x8x32xf32> to vector<1x8xf32>
    %20 = vector.shape_cast %19 : vector<1x8xf32> to vector<1x8x1xf32>
    %cst_11 = arith.constant 1.000000e-24 : f32
    %21 = vector.broadcast %cst_11 : f32 to vector<1x8x1xf32>
    %22 = arith.maximumf %20, %21 : vector<1x8x1xf32>
    %23 = math.rsqrt %22 : vector<1x8x1xf32>
    %24 = vector.broadcast %23 : vector<1x8x1xf32> to vector<1x8x32xf32>
    %25 = arith.mulf %17, %24 : vector<1x8x32xf32>
    %26 = arith.truncf %25 : vector<1x8x32xf32> to vector<1x8x32xbf16>
    %cst_12 = arith.constant dense<0.000000e+00> : vector<1x8x8xf32>
    %27 = tpu.matmul %26, %12, %cst_12 {dimension_numbers = #tpu.dot_dimension_numbers<[2], [2], [1], [1], [0, 0, 0, 1, 1, 1], [0], [0]>} : vector<1x8x32xbf16>, vector<1x8x32xbf16>, vector<1x8x8xf32> -> vector<1x8x8xf32>
    %28 = tpu.iota {dimensions = array<i32: 1>} : vector<1x8x8xi32>
    %c0_i32 = arith.constant 0 : i32
    %29 = vector.broadcast %c0_i32 : i32 to vector<1x8x8xi32>
    %30 = arith.addi %28, %29 : vector<1x8x8xi32>
    %31 = tpu.iota {dimensions = array<i32: 2>} : vector<1x8x8xi32>
    %32 = arith.cmpi eq, %30, %31 : vector<1x8x8xi32>
    %cst_13 = arith.constant 0.000000e+00 : f32
    %33 = vector.broadcast %cst_13 : f32 to vector<1x8x8xf32>
    %34 = arith.select %32, %27, %33 : vector<1x8x8xi1>, vector<1x8x8xf32>
    %cst_14 = arith.constant dense<0.000000e+00> : vector<1x8xf32>
    %35 = vector.multi_reduction <add>, %34, %cst_14 [1] : vector<1x8x8xf32> to vector<1x8xf32>
    %36 = vector.shape_cast %35 : vector<1x8xf32> to vector<1x1x8xf32>
    %cst_15 = arith.constant dense<0xFF800000> : vector<1x8xf32>
    %37 = vector.multi_reduction <maximumf>, %27, %cst_15 [1] : vector<1x8x8xf32> to vector<1x8xf32>
    %38 = vector.shape_cast %37 : vector<1x8xf32> to vector<1x1x8xf32>
    %39 = arith.maximumf %13, %38 : vector<1x1x8xf32>
    %40 = vector.broadcast %39 : vector<1x1x8xf32> to vector<1x8x8xf32>
    %41 = arith.subf %27, %40 : vector<1x8x8xf32>
    %42 = arith.truncf %41 : vector<1x8x8xf32> to vector<1x8x8xbf16>
    %43 = math.exp %42 : vector<1x8x8xbf16>
    %44 = arith.extf %43 : vector<1x8x8xbf16> to vector<1x8x8xf32>
    %45 = arith.subf %13, %39 : vector<1x1x8xf32>
    %46 = math.exp %45 : vector<1x1x8xf32>
    %47 = arith.mulf %14, %46 : vector<1x1x8xf32>
    %cst_16 = arith.constant dense<0.000000e+00> : vector<1x8xf32>
    %48 = vector.multi_reduction <add>, %44, %cst_16 [1] : vector<1x8x8xf32> to vector<1x8xf32>
    %49 = vector.shape_cast %48 : vector<1x8xf32> to vector<1x1x8xf32>
    %50 = arith.addf %47, %49 : vector<1x1x8xf32>
    %51 = arith.addf %15, %36 : vector<1x1x8xf32>
    %52 = math.log %50 : vector<1x1x8xf32>
    %53 = arith.addf %39, %52 : vector<1x1x8xf32>
    %54 = arith.subf %53, %51 : vector<1x1x8xf32>
    %c0_17 = arith.constant 0 : index
    %c0_18 = arith.constant 0 : index
    %c0_19 = arith.constant 0 : index
    %55 = vector.load %arg3[%c0_17, %c0_18, %c0_19] : memref<1x1x8xf32, #tpu.memory_space<vmem>>, vector<1x1x8xf32>
    tpu.vector_store %arg3[%c0_17, %c0_18, %c0_19], %54 {strides = array<i32>} : memref<1x1x8xf32, #tpu.memory_space<vmem>>, vector<1x1x8xf32>,
    return
  }
  func.func @transform_0(%arg0: i32) -> (i32, i32, i32) {
    %c0_i32 = arith.constant 0 : i32
    %c0_i32_0 = arith.constant 0 : i32
    %c0_i32_1 = arith.constant 0 : i32
    return %arg0, %c0_i32, %c0_i32_0 : i32, i32, i32
  }
  func.func @transform_1(%arg0: i32) -> (i32, i32, i32) {
    %c0_i32 = arith.constant 0 : i32
    %c0_i32_0 = arith.constant 0 : i32
    %c0_i32_1 = arith.constant 0 : i32
    return %arg0, %c0_i32, %c0_i32_0 : i32, i32, i32
  }
  func.func @transform_2(%arg0: i32) -> (i32, i32, i32) {
    %c0_i32 = arith.constant 0 : i32
    %c0_i32_0 = arith.constant 0 : i32
    %c0_i32_1 = arith.constant 0 : i32
    return %arg0, %c0_i32, %c0_i32_0 : i32, i32, i32
  }
}

</mosaic_0001>

<bundles_post_ra>
// kernel: tpu_custom_call.1
= control target key start
LH: loop header
LB: loop body
LE: loop exit
PB: predicated region body
PF: predicated region fallthrough
CT: control target
= control target key end

     0   :  { %7 = vsyncpa [#allocation3], 0  ;;  %s867_s0 = inlined_call_operand.hbm [shape: bf16[2,8,32], index: 0, kind: input, shape index: {}]   ;;  %s868_s1 = inlined_call_operand.hbm [shape: bf16[2,8,32], index: 1, kind: input, shape index: {}]   ;;  %s869_s2 = inlined_call_operand.hbm [shape: f32[2,1,8], index: 2, kind: output, shape index: {}]  }
   0x1   :  { %9 = vsyncpa [#allocation3 + $0x1], 0 }
   0x2   :  { %10 = vsyncpa [#allocation6], 0 }
   0x3   :  { %12 = vsyncpa [#allocation6 + $0x1], 0 }
   0x4   :  { %13 = vsyncpa [#allocation4], 0 }
   0x5   :  { %15 = vsyncpa [#allocation4 + $0x1], 0  ;;  %s650_s9 = smov 0   ;;  %s652_s10 = smov 0  }
   0x6   :  { %s654_s11 = smov 0   ;;  %s656_s12 = smov 0  }
   0x7 LB: > { %s671_s13 = sadd.s32 4294967295, %s628_s12   ;;  %s413_s14 = sadd.s32 4294967294, %s628_s12   ;;  %s628_s12 = sphi %s656_s12, %s888_s12   ;;  %s624_s11 = sphi %s654_s11, %s887_s11   ;;  %s620_s10 = sphi %s652_s10, %s886_s10   ;;  %s616_s9 = sphi %s650_s9, %s885_s9  }
   0x8   : > { %s675_s15 = sadd.s32 1, %s628_s12   ;;  %s28_s16 = sadd.s32 1, %s624_s11 }
   0x9   : > { %s25_s17 = ssub.s32 %s628_s12, %s675_s15  ;;  %p35_p0 = scmp.ne.s32.totalorder %s624_s11, %s620_s10 }
   0xa   : > { %p26_p1 = scmp.eq.s32.totalorder %s25_s17, 0  ;;  %p36_p2 = scmp.eq.s32.totalorder %s628_s12, 0 }
   0xb   : > { %p41_p3 = scmp.ne.s32.totalorder %s620_s10, %s616_s9  ;;  %p42_p4 = scmp.eq.s32.totalorder %s671_s13, 0 }
   0xc   : > { %s687_s18 = scalar_select %p26_p1, %s624_s11, %s28_s16  }
   0xd   : > { %p689_p5 = por %p36_p2, %p35_p0  ;;  %p693_p6 = por %p42_p4, %p41_p3 }
   0xe   : > { %p91_p7 = scmp.eq.s32.totalorder %s671_s13, 1  ;;  %p97_p8 = scmp.eq.s32.totalorder %s413_s14, 1 }
   0xf   : > { %s873_s20 = scalar_select %p693_p6, 1, 0 }
  0x10   : > { %p452_p10 = scmp.lt.s32.totalorder %s628_s12, 2  ;;  %p700_p11 = por %p91_p7, %p35_p0 }
  0x11   : > { %p704_p12 = por %p97_p8, %p41_p3  ;;  %s709_s23 = sand.u32 1, %s624_s11  }
  0x12   : > { %s874_s21 = scalar_select %p700_p11, 1, 0 }
  0x13   : > { %s875_s22 = scalar_select %p704_p12, 1, 0 }
  0x14   : > { %s417_s24 = sshll.u32 %s628_s12, 6  ;;  %s416_s25 = sshll.u32 %s709_s23, 2 }
  0x15   : > { %s718_s28 = scalar_lea.hbm %s867_s0, %s417_s24  ;;  %s121_s29 = scalar_lea.vmem [#allocation2], %s416_s25 }
  0x16   : > { %s128_s30 = sshll.u32 %s121_s29, 4  ;;  %p724_p13 = pnand %p452_p10, %p689_p5  ;;  %s728_s30 = int_to_ptr.vmem [resolvable:$true] %s128_s30 }
  0x17   : > { %s118_s4 = scalar_lea.sflag [#allocation3], %s709_s23  ;;  %s498_s5 = scalar_lea.hbm %s718_s28, 64 }
  0x18   : > { %p499_p2 = scmp.ne.s32.totalorder %s718_s28, %s498_s5  ;;  %p500_p3 = pneg %p724_p13 }
  0x19   : > { %s503_s8 = scalar_lea.hbm %s867_s0, 128  ;;  %p504_p5 = scmp.lt.u32.totalorder %s718_s28, %s867_s0 }
  0x1a   : > { %p501_p4 = pnand %p500_p3, %p499_p2  ;;  %p505_p8 = scmp.lt.u32.totalorder %s503_s8, %s498_s5 }
  0x1b   : > { %p507_p9 = scmp.lt.u32.totalorder %s498_s5, %s718_s28 }
  0x1c   : > { %p502_p7 = pneg %p501_p4  ;;  %p506_p10 = por %p505_p8, %p504_p5 }
  0x1e   : > { %p508_p0 = por %p507_p9, %p506_p10 }
  0x20   : > { %p509_p1 = pnand %p508_p0, %p502_p7 }
  0x22   : > { %512 = shalt.err (!%p509_p1)
}
  0x23   : > { %s513_s17 = scalar_lea.vmem %s728_s30, 64  ;;  %s630_s19 = smov [#allocation2]  }
  0x24   : > { %p514_p2 = scmp.ne.s32.totalorder %s728_s30, %s513_s17  ;;  %s518_s26 = sshll.u32 %s630_s19, 4  ;;  %s519_s26 = int_to_ptr.vmem [resolvable:$false] %s518_s26 }
  0x25   : > { %s520_s27 = scalar_lea.vmem %s519_s26, 128  ;;  %p521_p11 = scmp.lt.s32.totalorder %s728_s30, %s519_s26 }
  0x26   : > { %p516_p4 = pnand %p514_p2, %p500_p3  ;;  %p522_p5 = scmp.lt.s32.totalorder %s520_s27, %s513_s17 }
  0x28   : > { %p517_p12 = pneg %p516_p4  ;;  %p523_p8 = por %p522_p5, %p521_p11 }
  0x2a   : > { %p524_p9 = pnand %p523_p8, %p517_p12 }
  0x2c   : > { %527 = shalt.err (!%p524_p9)
}
  0x2d   : > { %444 = dma.hbm_to_vmem [thread:$0]  (!%p724_p13), %s718_s28, 64, %s728_s30, %s118_s4  }
  0x2e   : > { %p877_p0 = scmp.lt.s32.totalorder %s628_s12, 3  ;;  %p878_p1 = scmp.ge.s32.totalorder %s628_s12, 1 }
  0x2f   : > { %s771_s7 = scalar_lea.hbm %s868_s1, %s417_s24  ;;  %s139_s8 = scalar_lea.vmem [#allocation5], %s416_s25 }
  0x30   : > { %p762_p7 = pnand %p878_p1, %p877_p0  ;;  %s146_s14 = sshll.u32 %s139_s8, 4  ;;  %s147_s14 = int_to_ptr.vmem [resolvable:$true] %s146_s14 }
  0x31   : > { %s136_s28 = scalar_lea.sflag [#allocation6], %s709_s23  ;;  %s528_s30 = scalar_lea.hbm %s771_s7, 64 }
  0x32   : > { %s879_s29 = scalar_select %p762_p7, 1, 0 }
  0x33   : > { %p529_p11 = scmp.ne.s32.totalorder %s771_s7, %s528_s30  ;;  %s533_s24 = scalar_lea.hbm %s868_s1, 128 }
  0x34   : > { %p534_p2 = scmp.lt.u32.totalorder %s771_s7, %s868_s1  ;;  %p535_p4 = scmp.lt.u32.totalorder %s533_s24, %s528_s30 }
  0x35   : > { %p531_p12 = pnand %p529_p11, %p500_p3  ;;  %p537_p8 = scmp.lt.u32.totalorder %s528_s30, %s771_s7 }
  0x36   : > { %p536_p5 = por %p535_p4, %p534_p2 }
  0x37   : > { %p532_p10 = pneg %p531_p12 }
  0x38   : > { %p538_p9 = por %p537_p8, %p536_p5 }
  0x3a   : > { %p539_p0 = pnand %p538_p9, %p532_p10 }
  0x3c   : > { %542 = shalt.err (!%p539_p0)
}
  0x3d   : > { %s543_s23 = scalar_lea.vmem %s147_s14, 64  ;;  %s631_s25 = smov [#allocation5]  }
  0x3e   : > { %p544_p1 = scmp.ne.s32.totalorder %s147_s14, %s543_s23  ;;  %s548_s26 = sshll.u32 %s631_s25, 4  ;;  %s549_s26 = int_to_ptr.vmem [resolvable:$false] %s548_s26 }
  0x3f   : > { %s550_s27 = scalar_lea.vmem %s549_s26, 128  ;;  %p551_p6 = scmp.lt.s32.totalorder %s147_s14, %s549_s26 }
  0x40   : > { %p546_p11 = pnand %p544_p1, %p500_p3  ;;  %p552_p7 = scmp.lt.s32.totalorder %s550_s27, %s543_s23 }
  0x42   : > { %p547_p12 = pneg %p546_p11  ;;  %p553_p2 = por %p552_p7, %p551_p6 }
  0x44   : > { %p554_p4 = pnand %p553_p2, %p547_p12 }
  0x46   : > { %557 = shalt.err (!%p554_p4)
}
  0x47   : > { %447 = dma.hbm_to_vmem [thread:$0]  (!%p724_p13), %s771_s7, 64, %s147_s14, %s136_s28  }
  0x48   : > { %p880_p10 = scmp.ne.s32.totalorder %s879_s29, 0 }
  0x49   : > { %s798_s5 = sand.u32 (!%p880_p10), 1, %s620_s10   ;;  %p881_p3 = scmp.ne.s32.totalorder (!%p880_p10), %s873_s20, 0 }
  0x4a   : > { %155 = sbr.rel (%p880_p10) target bundleno = 552 (0x228), region = 28  ;;  %s421_s6 = sshll.u32 (!%p880_p10), %s798_s5, 2 }
  0x4b   : > { %s158_s8 = scalar_lea.sflag (!%p880_p10), [#allocation3], %s798_s5  ;;  %s161_s30 = scalar_lea.vmem (!%p880_p10), [#allocation2], %s421_s6 }
  0x51   : > { %603 = dma.done.wait (%p881_p3), %s158_s8, 64  }
  0x52   : > { %605 = vsyncadd (%p881_p3), %s158_s8, 4294967232  ;;  %s167_s3 = scalar_lea.sflag [#allocation6], %s798_s5  ;;  %s170_s7 = scalar_lea.vmem [#allocation5], %s421_s6 }
  0x53   : > { %607 = dma.done.wait (%p881_p3), %s167_s3, 64  }
  0x54   : > { %609 = vsyncadd (%p881_p3), %s167_s3, 4294967232  ;;  %v196_v0 = vld [vmem:[%s161_s30] sm:$0xf]  ;;  %v208_v1 = vld [vmem:[%s170_s7] sm:$0xf]  ;;  %vm199_vm0 = vcmask 261120   ;;  %v264_v37 = vlaneseq }
  0x55   : > { %v197_v2 = vunpack.c.l.bf16 %v196_v0  ;;  %v209_v3 = vunpack.c.l.bf16 %v208_v1  ;;  %v632_v8 = vmov 0.0   ;;  %vm633_vm1 = vmmov 0   ;;  %s424_s20 = sshll.u32 %s671_s13, 4  ;;  %s194_s29 = scalar_lea.vmem [#allocation7], %s798_s5 }
  0x56   : > { %429 = vmatprep.subr.bf16.mxu0 %v632_v8  ;;  %431 = vmatprep.mubr.msk.bf16.mxu0 %vm633_vm1, %v632_v8  ;;  %vm270_vm2 = vcmask 64512   ;;  %v265_v39 = vshrl.u32 %v264_v37, 7  ;;  %v267_v40 = vand.u32 127, %v264_v37  ;;  %s324_s14 = sshll.u32 %s194_s29, 4  ;;  %vm309_vm4 = vcmask 57344   ;;  %s823_s16 = scalar_lea.hbm %s869_s2, %s424_s20  ;;  %s825_s14 = int_to_ptr.vmem [resolvable:$true] %s324_s14 }
  0x57   : > { %v198_v4 = vmul.f32 %v197_v2, %v197_v2  ;;  %v210_v5 = vmul.f32 %v209_v3, %v209_v3  ;;  %s312_s24 = scalar_lea.sflag [#allocation4], %s798_s5  ;;  %s558_s17 = scalar_lea.vmem %s825_s14, 16 }
  0x58   : > { %vm268_vm3 = vcmp.eq.s32.totalorder %v265_v39, %v267_v40  ;;  %p559_p6 = scmp.ne.s32.totalorder %s825_s14, %s558_s17  ;;  %p882_p13 = scmp.ne.s32.totalorder %s874_s21, 0 }
  0x59   : > { %v200_v6 = vsel %vm199_vm0, %v198_v4, 0.0  ;;  %v211_v7 = vsel %vm199_vm0, %v210_v5, 0.0  ;;  %s634_s13 = smov [#allocation7]  }
  0x5a   : > { %201 = vadd.xlane.f32.xlu0 %v200_v6  ;;  %p560_p7 = pnand %p559_p6, %p882_p13  ;;  %s562_s19 = sshll.u32 %s634_s13, 4  ;;  %s563_s19 = int_to_ptr.vmem [resolvable:$false] %s562_s19 }
  0x5b   : > { %s564_s23 = scalar_lea.vmem %s563_s19, 32  ;;  %p565_p8 = scmp.lt.s32.totalorder %s825_s14, %s563_s19 }
  0x5c   : > { %p561_p5 = pneg %p560_p7  ;;  %p566_p9 = scmp.lt.s32.totalorder %s564_s23, %s558_s17 }
  0x5e   : > { %212 = vadd.xlane.f32.xlu0 %v211_v7  ;;  %p567_p0 = por %p566_p9, %p565_p8 }
  0x60   : > { %p568_p1 = pnand %p567_p0, %p561_p5 }
  0xe7   : > { %v202_v9 = vpop.xlane.xlu0 %201 }
  0xe8   : > { %v203_v10 = vmax.f32 %v202_v9, 1e-24 }
  0xea   : > { %488 = vrsqrt.f32 %v203_v10 }
  0xeb   : > { %v213_v11 = vpop.xlane.xlu0 %212 }
  0xec   : > { %v214_v12 = vmax.f32 %v213_v11, 1e-24 }
  0xee   : > { %490 = vrsqrt.f32 %v214_v12 }
  0xf4   : > { %v489_v13 = vpop.eup %488 }
  0xf5   : > { %v205_v14 = vmul.f32 14.285714, %v489_v13 }
  0xf7   : > { %v206_v15 = vmul.f32 %v205_v14, %v197_v2 }
  0xf8   : > { %v491_v16 = vpop.eup %490 }
  0xf9   : > { %v207_v17 = vpack.c.bf16 %v206_v15, %v206_v15  ;;  %v216_v19 = vmul.f32 %v491_v16, %v209_v3 }
  0xfb   : > { %v222_v18 = vsel %vm199_vm0, %v207_v17, 0  ;;  %v217_v20 = vpack.c.bf16 %v216_v19, %v216_v19 }
  0xfc   : > { %430 = vmatpush3.bf16.xpose.msra.mxu0 %v222_v18 }
 0x103   : > { %432 = vmatmul.mubr.msk.bf16.vlgmr.msra.gmra.mrb[0].mxu0 %vm199_vm0, %v217_v20 }
 0x1d6   : > { %v258_v21 = vpop.f32.mrb[0].mxu0 }
 0x1d7   : > { %v278_v22 = vsel %vm270_vm2, %v258_v21, -inf  ;;  %v433_v23 = vpop.f32.mrb[1].mxu0  ;;  %v269_v45 = vsel %vm268_vm3, %v258_v21, 0.0 }
 0x1d8   : > { %v279_v24 = vrot.slane %v278_v22, 4  ;;  %v261_v25 = vpop.f32.mrb[2].mxu0  ;;  %v271_v47 = vsel %vm270_vm2, %v269_v45, 0.0 }
 0x1d9   : > { %v434_v26 = vpop.f32.mrb[3].mxu0  ;;  %v272_v51 = vrot.slane %v271_v47, 4 }
 0x1da   : > { %v280_v27 = vmax.f32 %v278_v22, %v279_v24 }
 0x1db   : > { %v273_v55 = vadd.f32 %v272_v51, %v271_v47 }
 0x1dc   : > { %v281_v28 = vrot.slane %v280_v27, 2 }
 0x1dd   : > { %v274_v57 = vrot.slane %v273_v55, 2 }
 0x1de   : > { %v282_v29 = vmax.f32 %v280_v27, %v281_v28 }
 0x1df   : > { %v275_v58 = vadd.f32 %v274_v57, %v273_v55 }
 0x1e0   : > { %v283_v30 = vrot.slane %v282_v29, 1 }
 0x1e1   : > { %v276_v59 = vrot.slane %v275_v58, 1 }
 0x1e2   : > { %v284_v31 = vmax.f32 %v282_v29, %v283_v30 }
 0x1e3   : > { %v277_v62 = vadd.f32 %v276_v59, %v275_v58 }
 0x1e4   : > { %v285_v32 = vmax.f32 %v284_v31, -1e+30 }
 0x1e6   : > { %v286_v33 = vsub.f32 %v258_v21, %v285_v32  ;;  %v292_v36 = vsub.f32 -1e+30, %v285_v32 }
 0x1e8   : > { %v287_v34 = vpack.c.bf16 %v286_v33, %v286_v33  ;;  %v293_v38 = vmul.f32 1.442695, %v292_v36 }
 0x1ea   : > { %v289_v35 = vmul.bf16 1069105081, %v287_v34 }
 0x1ec   : > { %492 = vpow.bf16 %v289_v35 }
 0x1ed   : > { %494 = vpow2.f32 %v293_v38 }
 0x1f7   : > { %v493_v41 = vpop.eup %492 }
 0x1f8   : > { %v291_v42 = vunpack.c.l.bf16 %v493_v41  ;;  %v495_v50 = vpop.eup %494 }
 0x1f9   : > { %v295_v53 = vmul.f32 0.0, %v495_v50 }
 0x1fa   : > { %v296_v43 = vsel %vm270_vm2, %v291_v42, 0.0 }
 0x1fb   : > { %v297_v44 = vrot.slane %v296_v43, 4 }
 0x1fd   : > { %v298_v46 = vadd.f32 %v297_v44, %v296_v43 }
 0x1ff   : > { %v299_v48 = vrot.slane %v298_v46, 2 }
 0x201   : > { %v300_v49 = vadd.f32 %v299_v48, %v298_v46 }
 0x203   : > { %v301_v52 = vrot.slane %v300_v49, 1 }
 0x205   : > { %v302_v54 = vadd.f32 %v301_v52, %v300_v49 }
 0x207   : > { %v303_v56 = vadd.f32 %v302_v54, %v295_v53 }
 0x209   : > { %496 = vlog2.f32 %v303_v56 }
 0x213   : > { %v497_v60 = vpop.eup %496 }
 0x214   : > { %v306_v61 = vmul.f32 0.6931472, %v497_v60 }
 0x216   : > { %v307_v63 = vadd.f32 %v306_v61, %v285_v32 }
 0x218   : > { %v308_v0 = vsub.f32 %v307_v63, %v277_v62 }
 0x21a   : > { %310 = vst.msk [vmem:[%s194_s29] sm:$0x1] %vm309_vm4, %v308_v0 }
 0x21b   : > { %571 = shalt.err (!%p568_p1)
}
 0x21c   : > { %s572_s25 = scalar_lea.hbm %s823_s16, 16  ;;  %s576_s5 = scalar_lea.hbm %s869_s2, 32 }
 0x21d   : > { %p573_p11 = scmp.ne.s32.totalorder %s823_s16, %s572_s25  ;;  %p577_p4 = scmp.lt.u32.totalorder %s823_s16, %s869_s2 }
 0x21e   : > { %p578_p10 = scmp.lt.u32.totalorder %s576_s5, %s572_s25  ;;  %p580_p6 = scmp.lt.u32.totalorder %s572_s25, %s823_s16 }
 0x21f   : > { %p574_p12 = pnand %p573_p11, %p882_p13 }
 0x220   : > { %p579_p3 = por %p578_p10, %p577_p4 }
 0x221   : > { %p575_p2 = pneg %p574_p12 }
 0x222   : > { %p581_p7 = por %p580_p6, %p579_p3 }
 0x224   : > { %p582_p5 = pnand %p581_p7, %p575_p2 }
 0x226   : > { %585 = shalt.err (!%p582_p5)
}
 0x227   : > { %439 = dma.vmem_to_hbm [thread:$0]  (%p882_p13), %s825_s14, 16, %s823_s16, %s312_s24  }
 0x228 PF: > { %s336_s30 = sand.u32 1, %s616_s9   ;;  %p883_p8 = scmp.ne.s32.totalorder %s875_s22, 0 }
 0x229   : > { %p884_p9 = scmp.ge.s32.totalorder %s628_s12, 2  ;;  %s337_s3 = scalar_lea.sflag [#allocation4], %s336_s30 }
 0x22b   : > { %p449_p0 = pnand %p884_p9, %p883_p8 }
 0x22d   : > { %611 = dma.done.wait (!%p449_p0), %s337_s3, 16  }
 0x22e   : > { %613 = vsyncadd (!%p449_p0), %s337_s3, 4294967280  ;;  %p18_p1 = scmp.ge.s32.totalorder %s675_s15, 4   ;;  %s885_s9 = smov %s620_s10 }
 0x22f   : > { %s886_s10 = smov %s624_s11  ;;  %s887_s11 = smov %s687_s18 }
 0x230   : > { %s888_s12 = smov %s675_s15  ;;  %20 = sbr.rel (!%p18_p1) target bundleno = 7 (0x7), region = 86 }
 0x237   :  { %341 = vsyncpa [#allocation3], 1 }
 0x238   :  { %343 = vsyncpa [#allocation3 + $0x1], 1 }
 0x239   :  { %344 = vsyncpa [#allocation6], 1 }
 0x23a   :  { %346 = vsyncpa [#allocation6 + $0x1], 1 }
 0x23b   :  { %347 = vsyncpa [#allocation4], 1 }
 0x23c   :  { %349 = vsyncpa [#allocation4 + $0x1], 1 }

</bundles_post_ra>
